<compile_context>
chip_gen: v7x
topology: tpu7x:2x2x1
jax: 0.10.0
libtpu: 0.0.40
codegen_flags: <defaults>
</compile_context>

<pallas_src>
import jax
import jax.numpy as jnp
from jax import lax
from jax.experimental import pallas as pl
from jax.experimental.pallas import tpu as pltpu


def _generator_kernel(noise_ref, x0_ref, sel_ref,
                      wn_ref, wx_ref, be_ref,
                      w_ref, b_ref, g_ref, beta_ref,
                      wr_ref, br_ref,
                      out_ref):
    noise = noise_ref[...]            # (B, 15*dim) f32
    x0 = x0_ref[...]                  # (B, dim)    f32
    ngf = wr_ref.shape[0]
    inv_ngf = 1.0 / ngf

    # Strided skip noise[:, 0::15] as a 0/1 selection matmul: independent of the
    # serial layer chain, so it hides under the otherwise idle MXU slot.
    skip = jnp.dot(noise, sel_ref[...], preferred_element_type=jnp.float32)
    # Output epilogue constant hoisted off the critical tail.
    pre = x0 + skip + br_ref[...]

    # Fused input embeds: one lane-dense (B, 2*ngf) result; weight split along
    # in_dim so the wrapper never materializes cat([noise, x0]).
    e12 = (jnp.dot(noise, wn_ref[...], preferred_element_type=jnp.float32)
           + jnp.dot(x0, wx_ref[...], preferred_element_type=jnp.float32)
           + be_ref[...])
    e1 = e12[:, :ngf]                 # input_embed1(inp)  (lane offset 0: free)
    e2 = e12[:, ngf:]                 # input_embed2(inp)  (realign hidden behind layers1)

    def lrelu(h):
        return jnp.maximum(h, 0.2 * h)

    def layernorm(h, k, affine):
        # Single-pass LN: the two cross-lane reductions are independent and
        # overlap on the XLU instead of a dependent mean->center->mean chain.
        s1 = jnp.sum(h, axis=-1, keepdims=True)
        s2 = jnp.sum(h * h, axis=-1, keepdims=True)
        mu = s1 * inv_ngf
        var = s2 * inv_ngf - mu * mu
        n = (h - mu) * lax.rsqrt(var + 1e-5)
        if affine:
            n = n * g_ref[k] + beta_ref[k]
        return n

    def layer(y, k, act, affine):
        y = jnp.dot(y, w_ref[k], preferred_element_type=jnp.float32) + b_ref[k]
        if act:
            y = lrelu(y)
        return layernorm(y, k, affine)

    def block(h, blk, use_act):
        # Residual (use_act=True) / ResidualLin (use_act=False); static unroll.
        # For ResidualLin the first LN's gamma/beta are folded into the next
        # Linear at prep time -> affine=False for that LN here.
        k0 = blk * 2
        y = layer(h, k0, use_act, affine=use_act)
        y = layer(y, k0 + 1, use_act, affine=True)
        return h + y

    h1 = block(block(e1, 0, True), 1, True)       # layers1: Residual x2
    h = e2 + h1
    h = block(block(h, 2, False), 3, False)       # layers2: ResidualLin x2

    out_ref[...] = pre + jnp.dot(h, wr_ref[...], preferred_element_type=jnp.float32)


def generator_forward(noise, x0, kparams):
    B = noise.shape[0]
    dim = x0.shape[-1]

    args = (
        noise.astype(jnp.float32),
        x0.astype(jnp.float32),
        kparams["sel"],
        kparams["wn"], kparams["wx"], kparams["be"],
        kparams["w_stack"], kparams["b_stack"],
        kparams["g_stack"], kparams["beta_stack"],
        kparams["wr"], kparams["br"],
    )
    vmem = pl.BlockSpec(memory_space=pltpu.MemorySpace.VMEM)
    return pl.pallas_call(
        _generator_kernel,
        out_shape=jax.ShapeDtypeStruct((B, dim), jnp.float32),
        in_specs=[vmem] * len(args),
        out_specs=vmem,
    )(*args)
    # NOTE: for large production batches (B >= ~64), add grid=(B // B_TILE,)
    # with activation BlockSpecs ((B_TILE, F), lambda i: (i, 0)), constant-index
    # (resident) weight specs, and dimension_semantics=("parallel",) — on v7x
    # this shards batch tiles across both TensorCores.  Resident weights are
    # ~100 KB so B_TILE can be huge; at B=8 the ~0.35 us/step grid overhead
    # would dominate, so stay grid-less.


def init_params(key, cond_dim, ngf):
    """Raw parameters mirroring the PyTorch module (weights stored as (in, out))."""
    in_dim = 16 * cond_dim
    ks = jax.random.split(key, 32)

    def lin(k, fan_in, fan_out):
        kw, kb = jax.random.split(k)
        w = jax.random.normal(kw, (fan_in, fan_out), jnp.float32) / jnp.sqrt(fan_in)
        b = jax.random.normal(kb, (fan_out,), jnp.float32) * 0.01
        return w, b

    we1, be1 = lin(ks[0], in_dim, ngf)
    we2, be2 = lin(ks[1], in_dim, ngf)
    wr, br = lin(ks[2], ngf, cond_dim)

    # 8 (Linear, LayerNorm) pairs: entries 0-3 -> layers1 (Residual x2, LeakyReLU),
    # entries 4-7 -> layers2 (ResidualLin x2, no activation).
    w_l, b_l, g_l, bt_l = [], [], [], []
    for i in range(8):
        w, b = lin(ks[3 + i], ngf, ngf)
        g = 1.0 + 0.1 * jax.random.normal(ks[11 + i], (ngf,), jnp.float32)
        bt = 0.01 * jax.random.normal(ks[19 + i], (ngf,), jnp.float32)
        w_l.append(w); b_l.append(b); g_l.append(g); bt_l.append(bt)

    return {
        "we1": we1, "be1": be1, "we2": we2, "be2": be2,
        "wr": wr, "br": br,
        "w": jnp.stack(w_l), "b": jnp.stack(b_l),
        "g": jnp.stack(g_l), "beta": jnp.stack(bt_l),
    }


def prep_kernel_params(p, cond_dim):
    """Fuse / pre-shape raw params for the kernel."""
    w_e = jnp.concatenate([p["we1"], p["we2"]], axis=1)        # (16*dim, 2*ngf)
    b_e = jnp.concatenate([p["be1"], p["be2"]], axis=0)[None]  # (1, 2*ngf)
    split = 15 * cond_dim

    # 0/1 selection matrix implementing noise[:, 0::15] as a matmul.
    idx = jnp.arange(cond_dim)
    sel = jnp.zeros((15 * cond_dim, cond_dim), jnp.float32)
    sel = sel.at[idx * 15, idx].set(1.0)

    # Fold the first LayerNorm affine of each ResidualLin block (k=4, k=6) into
    # the following Linear (k=5, k=7):  W' = diag(g) @ W,  b' = beta @ W + b.
    # Legal only because no activation sits between that LN and the Linear.
    w = p["w"]
    b = p["b"]
    for k in (4, 6):
        w_next = p["w"][k + 1]
        b = b.at[k + 1].set(p["beta"][k] @ w_next + p["b"][k + 1])
        w = w.at[k + 1].set(p["g"][k][:, None] * w_next)

    return {
        "wn": w_e[:split],                      # (15*dim, 2*ngf) — noise rows
        "wx": w_e[split:],                      # (dim,    2*ngf) — x0 rows
        "be": b_e,
        "sel": sel,                             # (15*dim, dim)   — skip select
        "w_stack": w,                           # (8, ngf, ngf)   — k=5,7 folded
        "b_stack": b[:, None, :],               # (8, 1, ngf) — pre-broadcast
        "g_stack": p["g"][:, None, :],          # (8, 1, ngf) — k=4,6 unused
        "beta_stack": p["beta"][:, None, :],    # (8, 1, ngf) — k=4,6 unused
        "wr": p["wr"],                          # (ngf, dim)
        "br": p["br"][None, :],                 # (1, dim)
    }


def reference_forward(noise, x0, p):
    """Pure-JAX reference mirroring the PyTorch Generator exactly (raw params)."""
    inp = jnp.concatenate([noise, x0], axis=-1).astype(jnp.float32)

    def ln(h, g, bb):
        mu = jnp.mean(h, axis=-1, keepdims=True)
        var = jnp.mean((h - mu) ** 2, axis=-1, keepdims=True)
        return (h - mu) / jnp.sqrt(var + 1e-5) * g + bb

    def residual(h, idx):            # Residual: Linear->LeakyReLU->LN, twice
        y = h
        for j in range(2):
            k = idx * 2 + j
            y = y @ p["w"][k] + p["b"][k]
            y = jnp.where(y > 0, y, 0.2 * y)
            y = ln(y, p["g"][k], p["beta"][k])
        return h + y

    def residual_lin(h, idx):        # ResidualLin: Linear->LN, twice
        y = h
        for j in range(2):
            k = idx * 2 + j
            y = y @ p["w"][k] + p["b"][k]
            y = ln(y, p["g"][k], p["beta"][k])
        return h + y

    e1 = inp @ p["we1"] + p["be1"]
    e2 = inp @ p["we2"] + p["be2"]
    h1 = residual(residual(e1, 0), 1)
    h = residual_lin(residual_lin(e2 + h1, 2), 3)
    return x0 + noise[:, 0::15] + (h @ p["wr"] + p["br"])


if __name__ == "__main__":
    B, cond_dim, ngf = 8, 8, 32
    key = jax.random.PRNGKey(0)
    kn, kx, kp = jax.random.split(key, 3)
    noise = jax.random.normal(kn, (B, 15 * cond_dim), jnp.float32)   # (8, 120)
    x0 = jax.random.normal(kx, (B, cond_dim), jnp.float32)           # (8, 8)

    raw = init_params(kp, cond_dim, ngf)
    kparams = prep_kernel_params(raw, cond_dim)

    out = generator_forward(noise, x0, kparams)
    out = jax.block_until_ready(out)

    ref = reference_forward(noise, x0, raw)
    assert out.shape == (B, cond_dim), out.shape
    assert jnp.allclose(out, ref, atol=1e-4, rtol=1e-4), (out, ref)
    print("KERNEL_OK")
</pallas_src>

<mosaic_0001>
module attributes {stable_mosaic.version = 11 : i64} {
  func.func @_generator_kernel(%arg0: memref<8x120xf32, #tpu.memory_space<vmem>>, %arg1: memref<8x8xf32, #tpu.memory_space<vmem>>, %arg2: memref<120x8xf32, #tpu.memory_space<vmem>>, %arg3: memref<120x64xf32, #tpu.memory_space<vmem>>, %arg4: memref<8x64xf32, #tpu.memory_space<vmem>>, %arg5: memref<1x64xf32, #tpu.memory_space<vmem>>, %arg6: memref<8x32x32xf32, #tpu.memory_space<vmem>>, %arg7: memref<8x1x32xf32, #tpu.memory_space<vmem>>, %arg8: memref<8x1x32xf32, #tpu.memory_space<vmem>>, %arg9: memref<8x1x32xf32, #tpu.memory_space<vmem>>, %arg10: memref<32x8xf32, #tpu.memory_space<vmem>>, %arg11: memref<1x8xf32, #tpu.memory_space<vmem>>, %arg12: memref<8x8xf32, #tpu.memory_space<vmem>>) attributes {dimension_semantics = [], scalar_prefetch = 0 : i64, scratch_operands = 0 : i64, tpu.core_type = #tpu.core_type<tc>} {
    %c0 = arith.constant 0 : index
    %c0_0 = arith.constant 0 : index
    %0 = vector.load %arg0[%c0, %c0_0] : memref<8x120xf32, #tpu.memory_space<vmem>>, vector<8x120xf32>
    %c0_1 = arith.constant 0 : index
    %c0_2 = arith.constant 0 : index
    %1 = vector.load %arg1[%c0_1, %c0_2] : memref<8x8xf32, #tpu.memory_space<vmem>>, vector<8x8xf32>
    %c0_3 = arith.constant 0 : index
    %c0_4 = arith.constant 0 : index
    %2 = vector.load %arg2[%c0_3, %c0_4] : memref<120x8xf32, #tpu.memory_space<vmem>>, vector<120x8xf32>
    %cst = arith.constant dense<0.000000e+00> : vector<8x8xf32>
    %3 = tpu.matmul %0, %2, %cst {dimension_numbers = #tpu.dot_dimension_numbers<[1], [0], [0], [1], [0, 0, 1, 1], [], []>} : vector<8x120xf32>, vector<120x8xf32>, vector<8x8xf32> -> vector<8x8xf32>
    %4 = arith.addf %1, %3 : vector<8x8xf32>
    %c0_5 = arith.constant 0 : index
    %c0_6 = arith.constant 0 : index
    %5 = vector.load %arg11[%c0_5, %c0_6] : memref<1x8xf32, #tpu.memory_space<vmem>>, vector<1x8xf32>
    %6 = vector.broadcast %5 : vector<1x8xf32> to vector<8x8xf32>
    %7 = arith.addf %4, %6 : vector<8x8xf32>
    %c0_7 = arith.constant 0 : index
    %c0_8 = arith.constant 0 : index
    %8 = vector.load %arg3[%c0_7, %c0_8] : memref<120x64xf32, #tpu.memory_space<vmem>>, vector<120x64xf32>
    %cst_9 = arith.constant dense<0.000000e+00> : vector<8x64xf32>
    %9 = tpu.matmul %0, %8, %cst_9 {dimension_numbers = #tpu.dot_dimension_numbers<[1], [0], [0], [1], [0, 0, 1, 1], [], []>} : vector<8x120xf32>, vector<120x64xf32>, vector<8x64xf32> -> vector<8x64xf32>
    %c0_10 = arith.constant 0 : index
    %c0_11 = arith.constant 0 : index
    %10 = vector.load %arg4[%c0_10, %c0_11] : memref<8x64xf32, #tpu.memory_space<vmem>>, vector<8x64xf32>
    %cst_12 = arith.constant dense<0.000000e+00> : vector<8x64xf32>
    %11 = tpu.matmul %1, %10, %cst_12 {dimension_numbers = #tpu.dot_dimension_numbers<[1], [0], [0], [1], [0, 0, 1, 1], [], []>} : vector<8x8xf32>, vector<8x64xf32>, vector<8x64xf32> -> vector<8x64xf32>
    %12 = arith.addf %9, %11 : vector<8x64xf32>
    %c0_13 = arith.constant 0 : index
    %c0_14 = arith.constant 0 : index
    %13 = vector.load %arg5[%c0_13, %c0_14] : memref<1x64xf32, #tpu.memory_space<vmem>>, vector<1x64xf32>
    %14 = vector.broadcast %13 : vector<1x64xf32> to vector<8x64xf32>
    %15 = arith.addf %12, %14 : vector<8x64xf32>
    %16 = vector.extract_strided_slice %15 {offsets = [0, 0], sizes = [8, 32], strides = [1, 1]} : vector<8x64xf32> to vector<8x32xf32>
    %17 = vector.extract_strided_slice %15 {offsets = [0, 32], sizes = [8, 32], strides = [1, 1]} : vector<8x64xf32> to vector<8x32xf32>
    %c0_15 = arith.constant 0 : index
    %c0_16 = arith.constant 0 : index
    %c0_17 = arith.constant 0 : index
    %18 = vector.load %arg6[%c0_15, %c0_16, %c0_17] : memref<8x32x32xf32, #tpu.memory_space<vmem>>, vector<1x32x32xf32>
    %19 = vector.shape_cast %18 : vector<1x32x32xf32> to vector<32x32xf32>
    %cst_18 = arith.constant dense<0.000000e+00> : vector<8x32xf32>
    %20 = tpu.matmul %16, %19, %cst_18 {dimension_numbers = #tpu.dot_dimension_numbers<[1], [0], [0], [1], [0, 0, 1, 1], [], []>} : vector<8x32xf32>, vector<32x32xf32>, vector<8x32xf32> -> vector<8x32xf32>
    %c0_19 = arith.constant 0 : index
    %c0_20 = arith.constant 0 : index
    %c0_21 = arith.constant 0 : index
    %21 = vector.load %arg7[%c0_19, %c0_20, %c0_21] : memref<8x1x32xf32, #tpu.memory_space<vmem>>, vector<1x1x32xf32>
    %22 = vector.shape_cast %21 : vector<1x1x32xf32> to vector<1x32xf32>
    %23 = vector.broadcast %22 : vector<1x32xf32> to vector<8x32xf32>
    %24 = arith.addf %20, %23 : vector<8x32xf32>
    %cst_22 = arith.constant 2.000000e-01 : f32
    %25 = vector.broadcast %cst_22 : f32 to vector<8x32xf32>
    %26 = arith.mulf %25, %24 : vector<8x32xf32>
    %27 = arith.maximumf %24, %26 : vector<8x32xf32>
    %cst_23 = arith.constant dense<0.000000e+00> : vector<8xf32>
    %28 = vector.multi_reduction <add>, %27, %cst_23 [1] : vector<8x32xf32> to vector<8xf32>
    %29 = vector.shape_cast %28 : vector<8xf32> to vector<8x1xf32>
    %30 = arith.mulf %27, %27 : vector<8x32xf32>
    %cst_24 = arith.constant dense<0.000000e+00> : vector<8xf32>
    %31 = vector.multi_reduction <add>, %30, %cst_24 [1] : vector<8x32xf32> to vector<8xf32>
    %32 = vector.shape_cast %31 : vector<8xf32> to vector<8x1xf32>
    %cst_25 = arith.constant 3.125000e-02 : f32
    %33 = vector.broadcast %cst_25 : f32 to vector<8x1xf32>
    %34 = arith.mulf %29, %33 : vector<8x1xf32>
    %cst_26 = arith.constant 3.125000e-02 : f32
    %35 = vector.broadcast %cst_26 : f32 to vector<8x1xf32>
    %36 = arith.mulf %32, %35 : vector<8x1xf32>
    %37 = arith.mulf %34, %34 : vector<8x1xf32>
    %38 = arith.subf %36, %37 : vector<8x1xf32>
    %39 = vector.broadcast %34 : vector<8x1xf32> to vector<8x32xf32>
    %40 = arith.subf %27, %39 : vector<8x32xf32>
    %cst_27 = arith.constant 9.99999974E-6 : f32
    %41 = vector.broadcast %cst_27 : f32 to vector<8x1xf32>
    %42 = arith.addf %38, %41 : vector<8x1xf32>
    %43 = math.rsqrt %42 : vector<8x1xf32>
    %44 = vector.broadcast %43 : vector<8x1xf32> to vector<8x32xf32>
    %45 = arith.mulf %40, %44 : vector<8x32xf32>
    %c0_28 = arith.constant 0 : index
    %c0_29 = arith.constant 0 : index
    %c0_30 = arith.constant 0 : index
    %46 = vector.load %arg8[%c0_28, %c0_29, %c0_30] : memref<8x1x32xf32, #tpu.memory_space<vmem>>, vector<1x1x32xf32>
    %47 = vector.shape_cast %46 : vector<1x1x32xf32> to vector<1x32xf32>
    %48 = vector.broadcast %47 : vector<1x32xf32> to vector<8x32xf32>
    %49 = arith.mulf %45, %48 : vector<8x32xf32>
    %c0_31 = arith.constant 0 : index
    %c0_32 = arith.constant 0 : index
    %c0_33 = arith.constant 0 : index
    %50 = vector.load %arg9[%c0_31, %c0_32, %c0_33] : memref<8x1x32xf32, #tpu.memory_space<vmem>>, vector<1x1x32xf32>
    %51 = vector.shape_cast %50 : vector<1x1x32xf32> to vector<1x32xf32>
    %52 = vector.broadcast %51 : vector<1x32xf32> to vector<8x32xf32>
    %53 = arith.addf %49, %52 : vector<8x32xf32>
    %c1 = arith.constant 1 : index
    %c0_34 = arith.constant 0 : index
    %c0_35 = arith.constant 0 : index
    %54 = vector.load %arg6[%c1, %c0_34, %c0_35] : memref<8x32x32xf32, #tpu.memory_space<vmem>>, vector<1x32x32xf32>
    %55 = vector.shape_cast %54 : vector<1x32x32xf32> to vector<32x32xf32>
    %cst_36 = arith.constant dense<0.000000e+00> : vector<8x32xf32>
    %56 = tpu.matmul %53, %55, %cst_36 {dimension_numbers = #tpu.dot_dimension_numbers<[1], [0], [0], [1], [0, 0, 1, 1], [], []>} : vector<8x32xf32>, vector<32x32xf32>, vector<8x32xf32> -> vector<8x32xf32>
    %c1_37 = arith.constant 1 : index
    %c0_38 = arith.constant 0 : index
    %c0_39 = arith.constant 0 : index
    %57 = vector.load %arg7[%c1_37, %c0_38, %c0_39] : memref<8x1x32xf32, #tpu.memory_space<vmem>>, vector<1x1x32xf32>
    %58 = vector.shape_cast %57 : vector<1x1x32xf32> to vector<1x32xf32>
    %59 = vector.broadcast %58 : vector<1x32xf32> to vector<8x32xf32>
    %60 = arith.addf %56, %59 : vector<8x32xf32>
    %cst_40 = arith.constant 2.000000e-01 : f32
    %61 = vector.broadcast %cst_40 : f32 to vector<8x32xf32>
    %62 = arith.mulf %61, %60 : vector<8x32xf32>
    %63 = arith.maximumf %60, %62 : vector<8x32xf32>
    %cst_41 = arith.constant dense<0.000000e+00> : vector<8xf32>
    %64 = vector.multi_reduction <add>, %63, %cst_41 [1] : vector<8x32xf32> to vector<8xf32>
    %65 = vector.shape_cast %64 : vector<8xf32> to vector<8x1xf32>
    %66 = arith.mulf %63, %63 : vector<8x32xf32>
    %cst_42 = arith.constant dense<0.000000e+00> : vector<8xf32>
    %67 = vector.multi_reduction <add>, %66, %cst_42 [1] : vector<8x32xf32> to vector<8xf32>
    %68 = vector.shape_cast %67 : vector<8xf32> to vector<8x1xf32>
    %cst_43 = arith.constant 3.125000e-02 : f32
    %69 = vector.broadcast %cst_43 : f32 to vector<8x1xf32>
    %70 = arith.mulf %65, %69 : vector<8x1xf32>
    %cst_44 = arith.constant 3.125000e-02 : f32
    %71 = vector.broadcast %cst_44 : f32 to vector<8x1xf32>
    %72 = arith.mulf %68, %71 : vector<8x1xf32>
    %73 = arith.mulf %70, %70 : vector<8x1xf32>
    %74 = arith.subf %72, %73 : vector<8x1xf32>
    %75 = vector.broadcast %70 : vector<8x1xf32> to vector<8x32xf32>
    %76 = arith.subf %63, %75 : vector<8x32xf32>
    %cst_45 = arith.constant 9.99999974E-6 : f32
    %77 = vector.broadcast %cst_45 : f32 to vector<8x1xf32>
    %78 = arith.addf %74, %77 : vector<8x1xf32>
    %79 = math.rsqrt %78 : vector<8x1xf32>
    %80 = vector.broadcast %79 : vector<8x1xf32> to vector<8x32xf32>
    %81 = arith.mulf %76, %80 : vector<8x32xf32>
    %c1_46 = arith.constant 1 : index
    %c0_47 = arith.constant 0 : index
    %c0_48 = arith.constant 0 : index
    %82 = vector.load %arg8[%c1_46, %c0_47, %c0_48] : memref<8x1x32xf32, #tpu.memory_space<vmem>>, vector<1x1x32xf32>
    %83 = vector.shape_cast %82 : vector<1x1x32xf32> to vector<1x32xf32>
    %84 = vector.broadcast %83 : vector<1x32xf32> to vector<8x32xf32>
    %85 = arith.mulf %81, %84 : vector<8x32xf32>
    %c1_49 = arith.constant 1 : index
    %c0_50 = arith.constant 0 : index
    %c0_51 = arith.constant 0 : index
    %86 = vector.load %arg9[%c1_49, %c0_50, %c0_51] : memref<8x1x32xf32, #tpu.memory_space<vmem>>, vector<1x1x32xf32>
    %87 = vector.shape_cast %86 : vector<1x1x32xf32> to vector<1x32xf32>
    %88 = vector.broadcast %87 : vector<1x32xf32> to vector<8x32xf32>
    %89 = arith.addf %85, %88 : vector<8x32xf32>
    %90 = arith.addf %16, %89 : vector<8x32xf32>
    %c2 = arith.constant 2 : index
    %c0_52 = arith.constant 0 : index
    %c0_53 = arith.constant 0 : index
    %91 = vector.load %arg6[%c2, %c0_52, %c0_53] : memref<8x32x32xf32, #tpu.memory_space<vmem>>, vector<1x32x32xf32>
    %92 = vector.shape_cast %91 : vector<1x32x32xf32> to vector<32x32xf32>
    %cst_54 = arith.constant dense<0.000000e+00> : vector<8x32xf32>
    %93 = tpu.matmul %90, %92, %cst_54 {dimension_numbers = #tpu.dot_dimension_numbers<[1], [0], [0], [1], [0, 0, 1, 1], [], []>} : vector<8x32xf32>, vector<32x32xf32>, vector<8x32xf32> -> vector<8x32xf32>
    %c2_55 = arith.constant 2 : index
    %c0_56 = arith.constant 0 : index
    %c0_57 = arith.constant 0 : index
    %94 = vector.load %arg7[%c2_55, %c0_56, %c0_57] : memref<8x1x32xf32, #tpu.memory_space<vmem>>, vector<1x1x32xf32>
    %95 = vector.shape_cast %94 : vector<1x1x32xf32> to vector<1x32xf32>
    %96 = vector.broadcast %95 : vector<1x32xf32> to vector<8x32xf32>
    %97 = arith.addf %93, %96 : vector<8x32xf32>
    %cst_58 = arith.constant 2.000000e-01 : f32
    %98 = vector.broadcast %cst_58 : f32 to vector<8x32xf32>
    %99 = arith.mulf %98, %97 : vector<8x32xf32>
    %100 = arith.maximumf %97, %99 : vector<8x32xf32>
    %cst_59 = arith.constant dense<0.000000e+00> : vector<8xf32>
    %101 = vector.multi_reduction <add>, %100, %cst_59 [1] : vector<8x32xf32> to vector<8xf32>
    %102 = vector.shape_cast %101 : vector<8xf32> to vector<8x1xf32>
    %103 = arith.mulf %100, %100 : vector<8x32xf32>
    %cst_60 = arith.constant dense<0.000000e+00> : vector<8xf32>
    %104 = vector.multi_reduction <add>, %103, %cst_60 [1] : vector<8x32xf32> to vector<8xf32>
    %105 = vector.shape_cast %104 : vector<8xf32> to vector<8x1xf32>
    %cst_61 = arith.constant 3.125000e-02 : f32
    %106 = vector.broadcast %cst_61 : f32 to vector<8x1xf32>
    %107 = arith.mulf %102, %106 : vector<8x1xf32>
    %cst_62 = arith.constant 3.125000e-02 : f32
    %108 = vector.broadcast %cst_62 : f32 to vector<8x1xf32>
    %109 = arith.mulf %105, %108 : vector<8x1xf32>
    %110 = arith.mulf %107, %107 : vector<8x1xf32>
    %111 = arith.subf %109, %110 : vector<8x1xf32>
    %112 = vector.broadcast %107 : vector<8x1xf32> to vector<8x32xf32>
    %113 = arith.subf %100, %112 : vector<8x32xf32>
    %cst_63 = arith.constant 9.99999974E-6 : f32
    %114 = vector.broadcast %cst_63 : f32 to vector<8x1xf32>
    %115 = arith.addf %111, %114 : vector<8x1xf32>
    %116 = math.rsqrt %115 : vector<8x1xf32>
    %117 = vector.broadcast %116 : vector<8x1xf32> to vector<8x32xf32>
    %118 = arith.mulf %113, %117 : vector<8x32xf32>
    %c2_64 = arith.constant 2 : index
    %c0_65 = arith.constant 0 : index
    %c0_66 = arith.constant 0 : index
    %119 = vector.load %arg8[%c2_64, %c0_65, %c0_66] : memref<8x1x32xf32, #tpu.memory_space<vmem>>, vector<1x1x32xf32>
    %120 = vector.shape_cast %119 : vector<1x1x32xf32> to vector<1x32xf32>
    %121 = vector.broadcast %120 : vector<1x32xf32> to vector<8x32xf32>
    %122 = arith.mulf %118, %121 : vector<8x32xf32>
    %c2_67 = arith.constant 2 : index
    %c0_68 = arith.constant 0 : index
    %c0_69 = arith.constant 0 : index
    %123 = vector.load %arg9[%c2_67, %c0_68, %c0_69] : memref<8x1x32xf32, #tpu.memory_space<vmem>>, vector<1x1x32xf32>
    %124 = vector.shape_cast %123 : vector<1x1x32xf32> to vector<1x32xf32>
    %125 = vector.broadcast %124 : vector<1x32xf32> to vector<8x32xf32>
    %126 = arith.addf %122, %125 : vector<8x32xf32>
    %c3 = arith.constant 3 : index
    %c0_70 = arith.constant 0 : index
    %c0_71 = arith.constant 0 : index
    %127 = vector.load %arg6[%c3, %c0_70, %c0_71] : memref<8x32x32xf32, #tpu.memory_space<vmem>>, vector<1x32x32xf32>
    %128 = vector.shape_cast %127 : vector<1x32x32xf32> to vector<32x32xf32>
    %cst_72 = arith.constant dense<0.000000e+00> : vector<8x32xf32>
    %129 = tpu.matmul %126, %128, %cst_72 {dimension_numbers = #tpu.dot_dimension_numbers<[1], [0], [0], [1], [0, 0, 1, 1], [], []>} : vector<8x32xf32>, vector<32x32xf32>, vector<8x32xf32> -> vector<8x32xf32>
    %c3_73 = arith.constant 3 : index
    %c0_74 = arith.constant 0 : index
    %c0_75 = arith.constant 0 : index
    %130 = vector.load %arg7[%c3_73, %c0_74, %c0_75] : memref<8x1x32xf32, #tpu.memory_space<vmem>>, vector<1x1x32xf32>
    %131 = vector.shape_cast %130 : vector<1x1x32xf32> to vector<1x32xf32>
    %132 = vector.broadcast %131 : vector<1x32xf32> to vector<8x32xf32>
    %133 = arith.addf %129, %132 : vector<8x32xf32>
    %cst_76 = arith.constant 2.000000e-01 : f32
    %134 = vector.broadcast %cst_76 : f32 to vector<8x32xf32>
    %135 = arith.mulf %134, %133 : vector<8x32xf32>
    %136 = arith.maximumf %133, %135 : vector<8x32xf32>
    %cst_77 = arith.constant dense<0.000000e+00> : vector<8xf32>
    %137 = vector.multi_reduction <add>, %136, %cst_77 [1] : vector<8x32xf32> to vector<8xf32>
    %138 = vector.shape_cast %137 : vector<8xf32> to vector<8x1xf32>
    %139 = arith.mulf %136, %136 : vector<8x32xf32>
    %cst_78 = arith.constant dense<0.000000e+00> : vector<8xf32>
    %140 = vector.multi_reduction <add>, %139, %cst_78 [1] : vector<8x32xf32> to vector<8xf32>
    %141 = vector.shape_cast %140 : vector<8xf32> to vector<8x1xf32>
    %cst_79 = arith.constant 3.125000e-02 : f32
    %142 = vector.broadcast %cst_79 : f32 to vector<8x1xf32>
    %143 = arith.mulf %138, %142 : vector<8x1xf32>
    %cst_80 = arith.constant 3.125000e-02 : f32
    %144 = vector.broadcast %cst_80 : f32 to vector<8x1xf32>
    %145 = arith.mulf %141, %144 : vector<8x1xf32>
    %146 = arith.mulf %143, %143 : vector<8x1xf32>
    %147 = arith.subf %145, %146 : vector<8x1xf32>
    %148 = vector.broadcast %143 : vector<8x1xf32> to vector<8x32xf32>
    %149 = arith.subf %136, %148 : vector<8x32xf32>
    %cst_81 = arith.constant 9.99999974E-6 : f32
    %150 = vector.broadcast %cst_81 : f32 to vector<8x1xf32>
    %151 = arith.addf %147, %150 : vector<8x1xf32>
    %152 = math.rsqrt %151 : vector<8x1xf32>
    %153 = vector.broadcast %152 : vector<8x1xf32> to vector<8x32xf32>
    %154 = arith.mulf %149, %153 : vector<8x32xf32>
    %c3_82 = arith.constant 3 : index
    %c0_83 = arith.constant 0 : index
    %c0_84 = arith.constant 0 : index
    %155 = vector.load %arg8[%c3_82, %c0_83, %c0_84] : memref<8x1x32xf32, #tpu.memory_space<vmem>>, vector<1x1x32xf32>
    %156 = vector.shape_cast %155 : vector<1x1x32xf32> to vector<1x32xf32>
    %157 = vector.broadcast %156 : vector<1x32xf32> to vector<8x32xf32>
    %158 = arith.mulf %154, %157 : vector<8x32xf32>
    %c3_85 = arith.constant 3 : index
    %c0_86 = arith.constant 0 : index
    %c0_87 = arith.constant 0 : index
    %159 = vector.load %arg9[%c3_85, %c0_86, %c0_87] : memref<8x1x32xf32, #tpu.memory_space<vmem>>, vector<1x1x32xf32>
    %160 = vector.shape_cast %159 : vector<1x1x32xf32> to vector<1x32xf32>
    %161 = vector.broadcast %160 : vector<1x32xf32> to vector<8x32xf32>
    %162 = arith.addf %158, %161 : vector<8x32xf32>
    %163 = arith.addf %90, %162 : vector<8x32xf32>
    %164 = arith.addf %17, %163 : vector<8x32xf32>
    %c4 = arith.constant 4 : index
    %c0_88 = arith.constant 0 : index
    %c0_89 = arith.constant 0 : index
    %165 = vector.load %arg6[%c4, %c0_88, %c0_89] : memref<8x32x32xf32, #tpu.memory_space<vmem>>, vector<1x32x32xf32>
    %166 = vector.shape_cast %165 : vector<1x32x32xf32> to vector<32x32xf32>
    %cst_90 = arith.constant dense<0.000000e+00> : vector<8x32xf32>
    %167 = tpu.matmul %164, %166, %cst_90 {dimension_numbers = #tpu.dot_dimension_numbers<[1], [0], [0], [1], [0, 0, 1, 1], [], []>} : vector<8x32xf32>, vector<32x32xf32>, vector<8x32xf32> -> vector<8x32xf32>
    %c4_91 = arith.constant 4 : index
    %c0_92 = arith.constant 0 : index
    %c0_93 = arith.constant 0 : index
    %168 = vector.load %arg7[%c4_91, %c0_92, %c0_93] : memref<8x1x32xf32, #tpu.memory_space<vmem>>, vector<1x1x32xf32>
    %169 = vector.shape_cast %168 : vector<1x1x32xf32> to vector<1x32xf32>
    %170 = vector.broadcast %169 : vector<1x32xf32> to vector<8x32xf32>
    %171 = arith.addf %167, %170 : vector<8x32xf32>
    %cst_94 = arith.constant dense<0.000000e+00> : vector<8xf32>
    %172 = vector.multi_reduction <add>, %171, %cst_94 [1] : vector<8x32xf32> to vector<8xf32>
    %173 = vector.shape_cast %172 : vector<8xf32> to vector<8x1xf32>
    %174 = arith.mulf %171, %171 : vector<8x32xf32>
    %cst_95 = arith.constant dense<0.000000e+00> : vector<8xf32>
    %175 = vector.multi_reduction <add>, %174, %cst_95 [1] : vector<8x32xf32> to vector<8xf32>
    %176 = vector.shape_cast %175 : vector<8xf32> to vector<8x1xf32>
    %cst_96 = arith.constant 3.125000e-02 : f32
    %177 = vector.broadcast %cst_96 : f32 to vector<8x1xf32>
    %178 = arith.mulf %173, %177 : vector<8x1xf32>
    %cst_97 = arith.constant 3.125000e-02 : f32
    %179 = vector.broadcast %cst_97 : f32 to vector<8x1xf32>
    %180 = arith.mulf %176, %179 : vector<8x1xf32>
    %181 = arith.mulf %178, %178 : vector<8x1xf32>
    %182 = arith.subf %180, %181 : vector<8x1xf32>
    %183 = vector.broadcast %178 : vector<8x1xf32> to vector<8x32xf32>
    %184 = arith.subf %171, %183 : vector<8x32xf32>
    %cst_98 = arith.constant 9.99999974E-6 : f32
    %185 = vector.broadcast %cst_98 : f32 to vector<8x1xf32>
    %186 = arith.addf %182, %185 : vector<8x1xf32>
    %187 = math.rsqrt %186 : vector<8x1xf32>
    %188 = vector.broadcast %187 : vector<8x1xf32> to vector<8x32xf32>
    %189 = arith.mulf %184, %188 : vector<8x32xf32>
    %c5 = arith.constant 5 : index
    %c0_99 = arith.constant 0 : index
    %c0_100 = arith.constant 0 : index
    %190 = vector.load %arg6[%c5, %c0_99, %c0_100] : memref<8x32x32xf32, #tpu.memory_space<vmem>>, vector<1x32x32xf32>
    %191 = vector.shape_cast %190 : vector<1x32x32xf32> to vector<32x32xf32>
    %cst_101 = arith.constant dense<0.000000e+00> : vector<8x32xf32>
    %192 = tpu.matmul %189, %191, %cst_101 {dimension_numbers = #tpu.dot_dimension_numbers<[1], [0], [0], [1], [0, 0, 1, 1], [], []>} : vector<8x32xf32>, vector<32x32xf32>, vector<8x32xf32> -> vector<8x32xf32>
    %c5_102 = arith.constant 5 : index
    %c0_103 = arith.constant 0 : index
    %c0_104 = arith.constant 0 : index
    %193 = vector.load %arg7[%c5_102, %c0_103, %c0_104] : memref<8x1x32xf32, #tpu.memory_space<vmem>>, vector<1x1x32xf32>
    %194 = vector.shape_cast %193 : vector<1x1x32xf32> to vector<1x32xf32>
    %195 = vector.broadcast %194 : vector<1x32xf32> to vector<8x32xf32>
    %196 = arith.addf %192, %195 : vector<8x32xf32>
    %cst_105 = arith.constant dense<0.000000e+00> : vector<8xf32>
    %197 = vector.multi_reduction <add>, %196, %cst_105 [1] : vector<8x32xf32> to vector<8xf32>
    %198 = vector.shape_cast %197 : vector<8xf32> to vector<8x1xf32>
    %199 = arith.mulf %196, %196 : vector<8x32xf32>
    %cst_106 = arith.constant dense<0.000000e+00> : vector<8xf32>
    %200 = vector.multi_reduction <add>, %199, %cst_106 [1] : vector<8x32xf32> to vector<8xf32>
    %201 = vector.shape_cast %200 : vector<8xf32> to vector<8x1xf32>
    %cst_107 = arith.constant 3.125000e-02 : f32
    %202 = vector.broadcast %cst_107 : f32 to vector<8x1xf32>
    %203 = arith.mulf %198, %202 : vector<8x1xf32>
    %cst_108 = arith.constant 3.125000e-02 : f32
    %204 = vector.broadcast %cst_108 : f32 to vector<8x1xf32>
    %205 = arith.mulf %201, %204 : vector<8x1xf32>
    %206 = arith.mulf %203, %203 : vector<8x1xf32>
    %207 = arith.subf %205, %206 : vector<8x1xf32>
    %208 = vector.broadcast %203 : vector<8x1xf32> to vector<8x32xf32>
    %209 = arith.subf %196, %208 : vector<8x32xf32>
    %cst_109 = arith.constant 9.99999974E-6 : f32
    %210 = vector.broadcast %cst_109 : f32 to vector<8x1xf32>
    %211 = arith.addf %207, %210 : vector<8x1xf32>
    %212 = math.rsqrt %211 : vector<8x1xf32>
    %213 = vector.broadcast %212 : vector<8x1xf32> to vector<8x32xf32>
    %214 = arith.mulf %209, %213 : vector<8x32xf32>
    %c5_110 = arith.constant 5 : index
    %c0_111 = arith.constant 0 : index
    %c0_112 = arith.constant 0 : index
    %215 = vector.load %arg8[%c5_110, %c0_111, %c0_112] : memref<8x1x32xf32, #tpu.memory_space<vmem>>, vector<1x1x32xf32>
    %216 = vector.shape_cast %215 : vector<1x1x32xf32> to vector<1x32xf32>
    %217 = vector.broadcast %216 : vector<1x32xf32> to vector<8x32xf32>
    %218 = arith.mulf %214, %217 : vector<8x32xf32>
    %c5_113 = arith.constant 5 : index
    %c0_114 = arith.constant 0 : index
    %c0_115 = arith.constant 0 : index
    %219 = vector.load %arg9[%c5_113, %c0_114, %c0_115] : memref<8x1x32xf32, #tpu.memory_space<vmem>>, vector<1x1x32xf32>
    %220 = vector.shape_cast %219 : vector<1x1x32xf32> to vector<1x32xf32>
    %221 = vector.broadcast %220 : vector<1x32xf32> to vector<8x32xf32>
    %222 = arith.addf %218, %221 : vector<8x32xf32>
    %223 = arith.addf %164, %222 : vector<8x32xf32>
    %c6 = arith.constant 6 : index
    %c0_116 = arith.constant 0 : index
    %c0_117 = arith.constant 0 : index
    %224 = vector.load %arg6[%c6, %c0_116, %c0_117] : memref<8x32x32xf32, #tpu.memory_space<vmem>>, vector<1x32x32xf32>
    %225 = vector.shape_cast %224 : vector<1x32x32xf32> to vector<32x32xf32>
    %cst_118 = arith.constant dense<0.000000e+00> : vector<8x32xf32>
    %226 = tpu.matmul %223, %225, %cst_118 {dimension_numbers = #tpu.dot_dimension_numbers<[1], [0], [0], [1], [0, 0, 1, 1], [], []>} : vector<8x32xf32>, vector<32x32xf32>, vector<8x32xf32> -> vector<8x32xf32>
    %c6_119 = arith.constant 6 : index
    %c0_120 = arith.constant 0 : index
    %c0_121 = arith.constant 0 : index
    %227 = vector.load %arg7[%c6_119, %c0_120, %c0_121] : memref<8x1x32xf32, #tpu.memory_space<vmem>>, vector<1x1x32xf32>
    %228 = vector.shape_cast %227 : vector<1x1x32xf32> to vector<1x32xf32>
    %229 = vector.broadcast %228 : vector<1x32xf32> to vector<8x32xf32>
    %230 = arith.addf %226, %229 : vector<8x32xf32>
    %cst_122 = arith.constant dense<0.000000e+00> : vector<8xf32>
    %231 = vector.multi_reduction <add>, %230, %cst_122 [1] : vector<8x32xf32> to vector<8xf32>
    %232 = vector.shape_cast %231 : vector<8xf32> to vector<8x1xf32>
    %233 = arith.mulf %230, %230 : vector<8x32xf32>
    %cst_123 = arith.constant dense<0.000000e+00> : vector<8xf32>
    %234 = vector.multi_reduction <add>, %233, %cst_123 [1] : vector<8x32xf32> to vector<8xf32>
    %235 = vector.shape_cast %234 : vector<8xf32> to vector<8x1xf32>
    %cst_124 = arith.constant 3.125000e-02 : f32
    %236 = vector.broadcast %cst_124 : f32 to vector<8x1xf32>
    %237 = arith.mulf %232, %236 : vector<8x1xf32>
    %cst_125 = arith.constant 3.125000e-02 : f32
    %238 = vector.broadcast %cst_125 : f32 to vector<8x1xf32>
    %239 = arith.mulf %235, %238 : vector<8x1xf32>
    %240 = arith.mulf %237, %237 : vector<8x1xf32>
    %241 = arith.subf %239, %240 : vector<8x1xf32>
    %242 = vector.broadcast %237 : vector<8x1xf32> to vector<8x32xf32>
    %243 = arith.subf %230, %242 : vector<8x32xf32>
    %cst_126 = arith.constant 9.99999974E-6 : f32
    %244 = vector.broadcast %cst_126 : f32 to vector<8x1xf32>
    %245 = arith.addf %241, %244 : vector<8x1xf32>
    %246 = math.rsqrt %245 : vector<8x1xf32>
    %247 = vector.broadcast %246 : vector<8x1xf32> to vector<8x32xf32>
    %248 = arith.mulf %243, %247 : vector<8x32xf32>
    %c7 = arith.constant 7 : index
    %c0_127 = arith.constant 0 : index
    %c0_128 = arith.constant 0 : index
    %249 = vector.load %arg6[%c7, %c0_127, %c0_128] : memref<8x32x32xf32, #tpu.memory_space<vmem>>, vector<1x32x32xf32>
    %250 = vector.shape_cast %249 : vector<1x32x32xf32> to vector<32x32xf32>
    %cst_129 = arith.constant dense<0.000000e+00> : vector<8x32xf32>
    %251 = tpu.matmul %248, %250, %cst_129 {dimension_numbers = #tpu.dot_dimension_numbers<[1], [0], [0], [1], [0, 0, 1, 1], [], []>} : vector<8x32xf32>, vector<32x32xf32>, vector<8x32xf32> -> vector<8x32xf32>
    %c7_130 = arith.constant 7 : index
    %c0_131 = arith.constant 0 : index
    %c0_132 = arith.constant 0 : index
    %252 = vector.load %arg7[%c7_130, %c0_131, %c0_132] : memref<8x1x32xf32, #tpu.memory_space<vmem>>, vector<1x1x32xf32>
    %253 = vector.shape_cast %252 : vector<1x1x32xf32> to vector<1x32xf32>
    %254 = vector.broadcast %253 : vector<1x32xf32> to vector<8x32xf32>
    %255 = arith.addf %251, %254 : vector<8x32xf32>
    %cst_133 = arith.constant dense<0.000000e+00> : vector<8xf32>
    %256 = vector.multi_reduction <add>, %255, %cst_133 [1] : vector<8x32xf32> to vector<8xf32>
    %257 = vector.shape_cast %256 : vector<8xf32> to vector<8x1xf32>
    %258 = arith.mulf %255, %255 : vector<8x32xf32>
    %cst_134 = arith.constant dense<0.000000e+00> : vector<8xf32>
    %259 = vector.multi_reduction <add>, %258, %cst_134 [1] : vector<8x32xf32> to vector<8xf32>
    %260 = vector.shape_cast %259 : vector<8xf32> to vector<8x1xf32>
    %cst_135 = arith.constant 3.125000e-02 : f32
    %261 = vector.broadcast %cst_135 : f32 to vector<8x1xf32>
    %262 = arith.mulf %257, %261 : vector<8x1xf32>
    %cst_136 = arith.constant 3.125000e-02 : f32
    %263 = vector.broadcast %cst_136 : f32 to vector<8x1xf32>
    %264 = arith.mulf %260, %263 : vector<8x1xf32>
    %265 = arith.mulf %262, %262 : vector<8x1xf32>
    %266 = arith.subf %264, %265 : vector<8x1xf32>
    %267 = vector.broadcast %262 : vector<8x1xf32> to vector<8x32xf32>
    %268 = arith.subf %255, %267 : vector<8x32xf32>
    %cst_137 = arith.constant 9.99999974E-6 : f32
    %269 = vector.broadcast %cst_137 : f32 to vector<8x1xf32>
    %270 = arith.addf %266, %269 : vector<8x1xf32>
    %271 = math.rsqrt %270 : vector<8x1xf32>
    %272 = vector.broadcast %271 : vector<8x1xf32> to vector<8x32xf32>
    %273 = arith.mulf %268, %272 : vector<8x32xf32>
    %c7_138 = arith.constant 7 : index
    %c0_139 = arith.constant 0 : index
    %c0_140 = arith.constant 0 : index
    %274 = vector.load %arg8[%c7_138, %c0_139, %c0_140] : memref<8x1x32xf32, #tpu.memory_space<vmem>>, vector<1x1x32xf32>
    %275 = vector.shape_cast %274 : vector<1x1x32xf32> to vector<1x32xf32>
    %276 = vector.broadcast %275 : vector<1x32xf32> to vector<8x32xf32>
    %277 = arith.mulf %273, %276 : vector<8x32xf32>
    %c7_141 = arith.constant 7 : index
    %c0_142 = arith.constant 0 : index
    %c0_143 = arith.constant 0 : index
    %278 = vector.load %arg9[%c7_141, %c0_142, %c0_143] : memref<8x1x32xf32, #tpu.memory_space<vmem>>, vector<1x1x32xf32>
    %279 = vector.shape_cast %278 : vector<1x1x32xf32> to vector<1x32xf32>
    %280 = vector.broadcast %279 : vector<1x32xf32> to vector<8x32xf32>
    %281 = arith.addf %277, %280 : vector<8x32xf32>
    %282 = arith.addf %223, %281 : vector<8x32xf32>
    %c0_144 = arith.constant 0 : index
    %c0_145 = arith.constant 0 : index
    %283 = vector.load %arg10[%c0_144, %c0_145] : memref<32x8xf32, #tpu.memory_space<vmem>>, vector<32x8xf32>
    %cst_146 = arith.constant dense<0.000000e+00> : vector<8x8xf32>
    %284 = tpu.matmul %282, %283, %cst_146 {dimension_numbers = #tpu.dot_dimension_numbers<[1], [0], [0], [1], [0, 0, 1, 1], [], []>} : vector<8x32xf32>, vector<32x8xf32>, vector<8x8xf32> -> vector<8x8xf32>
    %285 = arith.addf %7, %284 : vector<8x8xf32>
    %c0_147 = arith.constant 0 : index
    %c0_148 = arith.constant 0 : index
    %286 = vector.load %arg12[%c0_147, %c0_148] : memref<8x8xf32, #tpu.memory_space<vmem>>, vector<8x8xf32>
    tpu.vector_store %arg12[%c0_147, %c0_148], %285 {strides = array<i32>} : memref<8x8xf32, #tpu.memory_space<vmem>>, vector<8x8xf32>,
    return
  }
}

</mosaic_0001>

<bundles_post_ra>
// kernel: tpu_custom_call.1
= control target key start
LH: loop header
LB: loop body
LE: loop exit
PB: predicated region body
PF: predicated region fallthrough
CT: control target
= control target key end

     0   :  { %vm158_vm0 = vcmask 64512   ;;  %v1821_v2 = vmov 0.0   ;;  %vm1822_vm1 = vmmov 0   ;;  %v1823_v8 = vmov 0.0|0.0   ;;  %s2292_s0 = inlined_call_operand.vmem [shape: f32[8,120], index: 0, kind: input, shape index: {}]   ;;  %s2293_s1 = inlined_call_operand.vmem [shape: f32[8,8], index: 1, kind: input, shape index: {}]   ;;  %s2294_s2 = inlined_call_operand.vmem [shape: f32[120,8], index: 2, kind: input, shape index: {}]   ;;  %s2295_s3 = inlined_call_operand.vmem [shape: f32[120,64], index: 3, kind: input, shape index: {}]   ;;  %s2296_s4 = inlined_call_operand.vmem [shape: f32[8,64], index: 4, kind: input, shape index: {}]   ;;  %s2297_s5 = inlined_call_operand.vmem [shape: f32[1,64], index: 5, kind: input, shape index: {}]   ;;  %s2298_s6 = inlined_call_operand.vmem [shape: f32[8,32,32], index: 6, kind: input, shape index: {}]   ;;  %s2299_s7 = inlined_call_operand.vmem [shape: f32[8,1,32], index: 7, kind: input, shape index: {}]   ;;  %s2300_s8 = inlined_call_operand.vmem [shape: f32[8,1,32], index: 8, kind: input, shape index: {}]   ;;  %s2301_s9 = inlined_call_operand.vmem [shape: f32[8,1,32], index: 9, kind: input, shape index: {}]   ;;  %s2302_s10 = inlined_call_operand.vmem [shape: f32[32,8], index: 10, kind: input, shape index: {}]   ;;  %s2303_s11 = inlined_call_operand.vmem [shape: f32[1,8], index: 11, kind: input, shape index: {}]   ;;  %s2304_s12 = inlined_call_operand.hbm [shape: f32[8,8], index: 12, kind: output, shape index: {}]  }
   0x1   :  { %v157_v0 = vld [vmem:[%s2296_s4] sm:$0xff]  ;;  %1538 = vmatprep.subr.mxu1 %v1821_v2  ;;  %1540 = vmatprep.mubr.msk.f32.mxu1 %vm1822_vm1, %v1821_v2  ;;  %v143_v4 = vld [vmem:[%s2295_s3 + $0x8] sm:$0xff]  ;;  %v144_v5 = vld [vmem:[%s2295_s3 + $0x10] sm:$0xff] }
   0x2   :  { %v1898_v1 = vld [vmem:[%s2293_s1] sm:$0xff]  ;;  %1539 = vmatpush3.msra.mxu1 %v157_v0  ;;  %v145_v7 = vld [vmem:[%s2295_s3 + $0x18] sm:$0xff]  ;;  %1675 = vmatprep.subr.bf16.mxu0 %v1823_v8  ;;  %v147_v11 = vld [vmem:[%s2295_s3 + $0x28] sm:$0xff] }
   0x3   :  { %v142_v3 = vld [vmem:[%s2295_s3] sm:$0xff]  ;;  %1541 = vmatmul.mubr.msk.f32.vlgmr.msra.gmra.mrb[0].mxu1 %vm158_vm0, %v1898_v1  ;;  %1696 = vmatprep.subr.bf16.mxu1 %v1823_v8  ;;  %v1700_v9 = vpack.c.bf16 %v145_v7, %v144_v5  ;;  %v45_v13 = vld [vmem:[%s2294_s2 + $0x8] sm:$0xff] }
   0x4   :  { %v1697_v6 = vpack.c.bf16 %v143_v4, %v142_v3  ;;  %1573 = vmatprep.mubr.msk.f32.mxu1 %vm1822_vm1, %v1821_v2  ;;  %v146_v10 = vld [vmem:[%s2295_s3 + $0x20] sm:$0xff]  ;;  %1535 = vmatprep.mubr.msk.f32.mxu0 %vm1822_vm1, %v1821_v2 }
   0x5   :  { %v44_v12 = vld [vmem:[%s2294_s2] sm:$0xff] }
   0x6   :  { %1698 = vmatpush3.bf16.msra.mxu1 %v1697_v6  ;;  %v1676_v14 = vpack.c.bf16 %v45_v13, %v44_v12 }
   0x7   :  { %1699 = vmatprep.subr.bf16.mxu1 %v1823_v8 }
   0x8   :  { %17 = vsyncpa [#allocation3], 0  ;;  %v1703_v15 = vpack.c.bf16 %v147_v11, %v146_v10  ;;  %v148_v16 = vld [vmem:[%s2295_s3 + $0x30] sm:$0xff]  ;;  %v149_v17 = vld [vmem:[%s2295_s3 + $0x38] sm:$0xff]  ;;  %1677 = vmatpush3.bf16.msra.mxu0 %v1676_v14  ;;  %vm59_vm2 = vcmask 982016   ;;  %vm321_vm3 = vcmask 261120  }
   0x9   :  { %1678 = vmatprep.subr.bf16.mxu0 %v1823_v8  ;;  %v1706_v18 = vpack.c.bf16 %v149_v17, %v148_v16  ;;  %v150_v19 = vld [vmem:[%s2295_s3 + $0x40] sm:$0xff]  ;;  %v151_v20 = vld [vmem:[%s2295_s3 + $0x48] sm:$0xff]  ;;  %v152_v22 = vld [vmem:[%s2295_s3 + $0x50] sm:$0xff]  ;;  %s1824_s19 = smov 32   ;;  %s1825_s20 = smov 96  }
   0xa   :  { %1701 = vmatpush3.bf16.msra.mxu1 %v1700_v9  ;;  %v1709_v21 = vpack.c.bf16 %v151_v20, %v150_v19  ;;  %v153_v23 = vld [vmem:[%s2295_s3 + $0x58] sm:$0xff]  ;;  %v154_v25 = vld [vmem:[%s2295_s3 + $0x60] sm:$0xff]  ;;  %v155_v26 = vld [vmem:[%s2295_s3 + $0x68] sm:$0xff] }
   0xb   :  { %1702 = vmatprep.subr.bf16.mxu1 %v1823_v8  ;;  %v1712_v24 = vpack.c.bf16 %v153_v23, %v152_v22  ;;  %v1715_v27 = vpack.c.bf16 %v155_v26, %v154_v25  ;;  %v156_v28 = vld [vmem:[%s2295_s3 + $0x70] sm:$0xff]  ;;  %v42_v29 = vld [vmem:[%s2292_s0] sm:$0xff]  ;;  %v47_v31 = vld [vmem:[%s2294_s2 + $0x18] sm:$0xff] }
   0xc   :  { %v46_v30 = vld [vmem:[%s2294_s2 + $0x10] sm:$0xff]  ;;  %v48_v33 = vld [vmem:[%s2294_s2 + $0x20] sm:$0xff]  ;;  %v49_v34 = vld [vmem:[%s2294_s2 + $0x28] sm:$0xff] }
   0xd   :  { %v1679_v32 = vpack.c.bf16 %v47_v31, %v46_v30  ;;  %v1682_v35 = vpack.c.bf16 %v49_v34, %v48_v33  ;;  %v50_v36 = vld [vmem:[%s2294_s2 + $0x30] sm:$0xff]  ;;  %v51_v37 = vld [vmem:[%s2294_s2 + $0x38] sm:$0xff]  ;;  %v52_v39 = vld [vmem:[%s2294_s2 + $0x40] sm:$0xff] }
   0xe   :  { %1704 = vmatpush3.bf16.msra.mxu1 %v1703_v15  ;;  %v1685_v38 = vpack.c.bf16 %v51_v37, %v50_v36  ;;  %v53_v40 = vld [vmem:[%s2294_s2 + $0x48] sm:$0xff]  ;;  %v54_v42 = vld [vmem:[%s2294_s2 + $0x50] sm:$0xff]  ;;  %v55_v43 = vld [vmem:[%s2294_s2 + $0x58] sm:$0xff] }
   0xf   :  { %1705 = vmatprep.subr.bf16.mxu1 %v1823_v8  ;;  %1680 = vmatpush3.bf16.msra.mxu0 %v1679_v32  ;;  %v1688_v41 = vpack.c.bf16 %v53_v40, %v52_v39  ;;  %v1691_v44 = vpack.c.bf16 %v55_v43, %v54_v42  ;;  %v56_v45 = vld [vmem:[%s2294_s2 + $0x60] sm:$0xff]  ;;  %v57_v46 = vld [vmem:[%s2294_s2 + $0x68] sm:$0xff]  ;;  %v58_v50 = vld [vmem:[%s2294_s2 + $0x70] sm:$0xff] }
  0x10   :  { %1681 = vmatprep.subr.bf16.mxu0 %v1823_v8  ;;  %v1694_v47 = vpack.c.bf16 %v57_v46, %v56_v45  ;;  %v310_v48 = vld [vmem:[%s2298_s6] sm:$0xff]  ;;  %v311_v49 = vld [vmem:[%s2298_s6 + $0x8] sm:$0xff]  ;;  %v312_v52 = vld [vmem:[%s2298_s6 + $0x10] sm:$0xff] }
  0x11   :  { %v1718_v51 = vpack.c.bf16 %v311_v49, %v310_v48  ;;  %v313_v53 = vld [vmem:[%s2298_s6 + $0x18] sm:$0xff]  ;;  %v1351_v58 = vld [vmem:[%s2297_s5] ss:$0 sm:$0xff]  ;;  %v1357_v11 = vld [vmem:[%s2298_s6 + $0x28] sm:$0xff] }
  0x12   :  { %1707 = vmatpush3.bf16.msra.mxu1 %v1706_v18  ;;  %v1721_v54 = vpack.c.bf16 %v313_v53, %v312_v52  ;;  %v1352_v62 = vld [vmem:[%s2299_s7] ss:$0 sm:$0xff]  ;;  %v1358_v13 = vld [vmem:[%s2298_s6 + $0x30] sm:$0xff]  ;;  %v1359_v14 = vld [vmem:[%s2298_s6 + $0x38] sm:$0xff] }
  0x13   :  { %1708 = vmatprep.subr.bf16.mxu1 %v1823_v8  ;;  %1683 = vmatpush3.bf16.msra.mxu0 %v1682_v35  ;;  %v1356_v10 = vld [vmem:[%s2298_s6 + $0x20] sm:$0xff]  ;;  %v1727_v15 = vpack.c.bf16 %v1359_v14, %v1358_v13  ;;  %v1368_v40 = vld [vmem:[%s2298_s6 + $0x48] sm:$0xff]  ;;  %v1369_v42 = vld [vmem:[%s2298_s6 + $0x50] sm:$0xff] }
  0x14   :  { %1684 = vmatprep.subr.bf16.mxu0 %v1823_v8  ;;  %v1724_v12 = vpack.c.bf16 %v1357_v11, %v1356_v10  ;;  %v1354_v25 = vld [vmem:[%s2300_s8] ss:$0 sm:$0xff]  ;;  %v1361_v30 = vld [vmem:[%s2299_s7 + $0x1] ss:$0 sm:$0xff]  ;;  %v1370_v43 = vld [vmem:[%s2298_s6 + $0x58] sm:$0xff] }
  0x15   :  { %v1367_v39 = vld [vmem:[%s2298_s6 + $0x40] sm:$0xff]  ;;  %v1379_v10 = vld [vmem:[%s2298_s6 + $0x68] sm:$0xff]  ;;  %v1381_v13 = vld [vmem:[%s2298_s6 + $0x78] sm:$0xff] }
  0x16   :  { %1710 = vmatpush3.bf16.msra.mxu1 %v1709_v21 }
  0x17   :  { %1711 = vmatprep.subr.bf16.mxu1 %v1823_v8  ;;  %1686 = vmatpush3.bf16.msra.mxu0 %v1685_v38 }
  0x18   :  { %1687 = vmatprep.subr.bf16.mxu0 %v1823_v8 }
  0x1a   :  { %1713 = vmatpush3.bf16.msra.mxu1 %v1712_v24 }
  0x1b   :  { %1714 = vmatprep.subr.bf16.mxu1 %v1823_v8  ;;  %1689 = vmatpush3.bf16.msra.mxu0 %v1688_v41  ;;  %v1730_v41 = vpack.c.bf16 %v1368_v40, %v1367_v39 }
  0x1c   :  { %1690 = vmatprep.subr.bf16.mxu0 %v1823_v8 }
  0x1e   :  { %1716 = vmatpush3.bf16.msra.mxu1 %v1715_v27  ;;  %v1355_v27 = vld [vmem:[%s2301_s9] ss:$0 sm:$0xff] }
  0x1f   :  { %1571 = vmatprep.subr.mxu1 %v1821_v2  ;;  %1692 = vmatpush3.bf16.msra.mxu0 %v1691_v44  ;;  %v1733_v44 = vpack.c.bf16 %v1370_v43, %v1369_v42 }
  0x20   :  { %1693 = vmatprep.subr.bf16.mxu0 %v1823_v8 }
  0x22   :  { %1572 = vmatpush3.msra.mxu1 %v156_v28 }
  0x23   :  { %1574 = vmatmul.mubr.msk.f32.vlgmr.msra.gmra.mrb[2].mxu1 %vm59_vm2, %v42_v29  ;;  %1723 = vmatprep.subr.bf16.mxu1 %v1823_v8 }
  0x24   :  { %1595 = vmatprep.mubr.msk.f32.mxu1 %vm1822_vm1, %v1821_v2  ;;  %1695 = vmatpush3.bf16.msra.mxu0 %v1694_v47 }
  0x25   :  { %1533 = vmatprep.subr.mxu0 %v1821_v2  ;;  %1725 = vmatpush3.bf16.msra.mxu1 %v1724_v12  ;;  %v1380_v12 = vld [vmem:[%s2298_s6 + $0x70] sm:$0xff] }
  0x26   :  { %1726 = vmatprep.subr.bf16.mxu1 %v1823_v8  ;;  %v1739_v14 = vpack.c.bf16 %v1381_v13, %v1380_v12  ;;  %v1399_v12 = vld [vmem:[%s2298_s6 + $0xb8] sm:$0xff] }
  0x28   :  { %1534 = vmatpush3.msra.mxu0 %v58_v50 }
  0x29   :  { %1717 = vmatprep.subr.bf16.mxu0 %v1823_v8  ;;  %1536 = vmatmul.mubr.msk.f32.vlgmr.msra.gmra.mrb[0].mxu0 %vm59_vm2, %v42_v29 }
  0x2a   :  { %1719 = vmatpush3.bf16.msra.mxu0 %v1718_v51  ;;  %1584 = vmatprep.mubr.msk.f32.mxu0 %vm1822_vm1, %v1821_v2 }
  0x2b   :  { %1720 = vmatprep.subr.bf16.mxu0 %v1823_v8  ;;  %1728 = vmatpush3.bf16.msra.mxu1 %v1727_v15 }
  0x2c   :  { %1735 = vmatprep.subr.bf16.mxu1 %v1823_v8 }
  0x2e   :  { %1722 = vmatpush3.bf16.msra.mxu0 %v1721_v54  ;;  %v1364_v54 = vld [vmem:[%s2300_s8 + $0x1] ss:$0 sm:$0xff] }
  0x2f   :  { %1729 = vmatprep.subr.bf16.mxu0 %v1823_v8 }
  0xd6   :  { %v228_v55 = vpop.f32.mrb[0].mxu1 }
  0xd7   :  { %v1542_v56 = vpop.f32.mrb[1].mxu1 }
  0xd8   :  { %v1366_v56 = vld [vmem:[%s2301_s9 + $0x1] ss:$0 sm:$0xff] }
  0xf6   :  { %v298_v57 = vpop.f32.mrb[2].mxu1 }
  0xf7   :  { %v299_v59 = vadd.f32 %v298_v57, %v228_v55  ;;  %v1575_v60 = vpop.f32.mrb[3].mxu1 }
  0xf8   :  { %v1372_v60 = vld [vmem:[%s2299_s7 + $0x2] ss:$0 sm:$0xff] }
  0xf9   :  { %v2043_v61 = vadd.f32 %v1351_v58, %v299_v59 }
  0xfb   :  { %1585 = vmatmul.mubr.msk.f32.vlgmr.msra.gmra.mrb[2].mxu0 %vm321_vm3, %v2043_v61 }
  0xfc   :  { %1606 = vmatprep.mubr.msk.f32.mxu0 %vm1822_vm1, %v1821_v2  ;;  %1731 = vmatpush3.bf16.msra.mxu0 %v1730_v41 }
  0xfd   :  { %1732 = vmatprep.subr.bf16.mxu0 %v1823_v8 }
 0x100   :  { %1734 = vmatpush3.bf16.msra.mxu0 %v1733_v44 }
 0x101   :  { %1741 = vmatprep.subr.bf16.mxu0 %v1823_v8 }
 0x1ce   :  { %v391_v63 = vpop.f32.mrb[2].mxu0 }
 0x1cf   :  { %v392_v0 = vadd.f32 %v1352_v62, %v391_v63  ;;  %v1586_v3 = vpop.f32.mrb[3].mxu0 }
 0x1d1   :  { %v395_v4 = vmul.f32 0.2, %v392_v0 }
 0x1d3   :  { %v396_v5 = vmax.f32 %v392_v0, %v395_v4 }
 0x1d5   :  { %v397_v6 = vsel %vm321_vm3, %v396_v5, 0.0  ;;  %v400_v7 = vmul.f32 %v396_v5, %v396_v5 }
 0x1d6   :  { %398 = vadd.xlane.f32.xlu0 %v397_v6 }
 0x1d7   :  { %v401_v9 = vsel %vm321_vm3, %v400_v7, 0.0 }
 0x1da   :  { %402 = vadd.xlane.f32.xlu0 %v401_v9  ;;  %v1378_v9 = vld [vmem:[%s2298_s6 + $0x60] sm:$0xff] }
 0x1db   :  { %v1736_v11 = vpack.c.bf16 %v1379_v10, %v1378_v9  ;;  %v1397_v9 = vld [vmem:[%s2298_s6 + $0xa8] sm:$0xff]  ;;  %v1398_v10 = vld [vmem:[%s2298_s6 + $0xb0] sm:$0xff] }
 0x1dc   :  { %v1751_v13 = vpack.c.bf16 %v1399_v12, %v1398_v10 }
 0x263   :  { %v399_v16 = vpop.xlane.xlu0 %398 }
 0x264   :  { %v404_v17 = vmul.f32 0.03125, %v399_v16 }
 0x266   :  { %v406_v19 = vmul.f32 %v404_v17, %v404_v17  ;;  %v408_v23 = vsub.f32 %v396_v5, %v404_v17 }
 0x267   :  { %v403_v18 = vpop.xlane.xlu0 %402 }
 0x268   :  { %v405_v20 = vmul.f32 0.03125, %v403_v18 }
 0x26a   :  { %v407_v21 = vsub.f32 %v405_v20, %v406_v19 }
 0x26c   :  { %v409_v22 = vadd.f32 1e-05, %v407_v21 }
 0x26e   :  { %1781 = vrsqrt.f32 %v409_v22 }
 0x278   :  { %v1782_v24 = vpop.eup %1781 }
 0x279   :  { %v411_v26 = vmul.f32 %v1782_v24, %v408_v23  ;;  %v1375_v24 = vld [vmem:[%s2300_s8 + $0x2] ss:$0 sm:$0xff] }
 0x27b   :  { %v419_v28 = vmul.f32 %v1354_v25, %v411_v26  ;;  %v1377_v26 = vld [vmem:[%s2301_s9 + $0x2] ss:$0 sm:$0xff] }
 0x27d   :  { %v427_v29 = vadd.f32 %v1355_v27, %v419_v28 }
 0x27f   :  { %1596 = vmatmul.mubr.msk.f32.vlgmr.msra.gmra.mrb[4].mxu1 %vm321_vm3, %v427_v29  ;;  %v1383_v29 = vld [vmem:[%s2299_s7 + $0x3] ss:$0 sm:$0xff] }
 0x280   :  { %1617 = vmatprep.mubr.msk.f32.mxu1 %vm1822_vm1, %v1821_v2  ;;  %1737 = vmatpush3.bf16.msra.mxu1 %v1736_v11 }
 0x281   :  { %1738 = vmatprep.subr.bf16.mxu1 %v1823_v8 }
 0x284   :  { %1740 = vmatpush3.bf16.msra.mxu1 %v1739_v14 }
 0x285   :  { %1747 = vmatprep.subr.bf16.mxu1 %v1823_v8 }
 0x352   :  { %v510_v31 = vpop.f32.mrb[4].mxu1 }
 0x353   :  { %v511_v32 = vadd.f32 %v1361_v30, %v510_v31  ;;  %v1597_v33 = vpop.f32.mrb[5].mxu1 }
 0x355   :  { %v514_v34 = vmul.f32 0.2, %v511_v32 }
 0x357   :  { %v515_v35 = vmax.f32 %v511_v32, %v514_v34 }
 0x359   :  { %v516_v36 = vsel %vm321_vm3, %v515_v35, 0.0  ;;  %v519_v37 = vmul.f32 %v515_v35, %v515_v35 }
 0x35a   :  { %517 = vadd.xlane.f32.xlu1 %v516_v36 }
 0x35b   :  { %v520_v38 = vsel %vm321_vm3, %v519_v37, 0.0 }
 0x35e   :  { %521 = vadd.xlane.f32.xlu1 %v520_v38 }
 0x3e7   :  { %v518_v45 = vpop.xlane.xlu1 %517 }
 0x3e8   :  { %v523_v46 = vmul.f32 0.03125, %v518_v45  ;;  %v1389_v45 = vld [vmem:[%s2298_s6 + $0x80] sm:$0xff] }
 0x3ea   :  { %v525_v48 = vmul.f32 %v523_v46, %v523_v46  ;;  %v527_v52 = vsub.f32 %v515_v35, %v523_v46  ;;  %v1390_v46 = vld [vmem:[%s2298_s6 + $0x88] sm:$0xff] }
 0x3eb   :  { %v522_v47 = vpop.xlane.xlu1 %521 }
 0x3ec   :  { %v524_v49 = vmul.f32 0.03125, %v522_v47  ;;  %v1391_v47 = vld [vmem:[%s2298_s6 + $0x90] sm:$0xff] }
 0x3ee   :  { %v526_v50 = vsub.f32 %v524_v49, %v525_v48  ;;  %v1742_v49 = vpack.c.bf16 %v1390_v46, %v1389_v45  ;;  %v1404_v46 = vld [vmem:[%s2300_s8 + $0x5] ss:$0 sm:$0xff] }
 0x3f0   :  { %v528_v51 = vadd.f32 1e-05, %v526_v50  ;;  %v1392_v50 = vld [vmem:[%s2298_s6 + $0x98] sm:$0xff] }
 0x3f2   :  { %1783 = vrsqrt.f32 %v528_v51 }
 0x3fc   :  { %v1784_v53 = vpop.eup %1783 }
 0x3fd   :  { %v530_v55 = vmul.f32 %v1784_v53, %v527_v52  ;;  %v1386_v52 = vld [vmem:[%s2300_s8 + $0x3] ss:$0 sm:$0xff] }
 0x3ff   :  { %v539_v57 = vmul.f32 %v1364_v54, %v530_v55  ;;  %v1745_v54 = vpack.c.bf16 %v1392_v50, %v1391_v47  ;;  %v1388_v55 = vld [vmem:[%s2301_s9 + $0x3] ss:$0 sm:$0xff] }
 0x401   :  { %v548_v58 = vadd.f32 %v1366_v56, %v539_v57 }
 0x403   :  { %v2103_v59 = vadd.f32 %v548_v58, %v2043_v61 }
 0x405   :  { %1607 = vmatmul.mubr.msk.f32.vlgmr.msra.gmra.mrb[4].mxu0 %vm321_vm3, %v2103_v59 }
 0x406   :  { %1628 = vmatprep.mubr.msk.f32.mxu0 %vm1822_vm1, %v1821_v2  ;;  %1743 = vmatpush3.bf16.msra.mxu0 %v1742_v49 }
 0x407   :  { %1744 = vmatprep.subr.bf16.mxu0 %v1823_v8 }
 0x40a   :  { %1746 = vmatpush3.bf16.msra.mxu0 %v1745_v54  ;;  %v1412_v54 = vld [vmem:[%s2299_s7 + $0x6] ss:$0 sm:$0xff] }
 0x40b   :  { %1753 = vmatprep.subr.bf16.mxu0 %v1823_v8 }
 0x4d8   :  { %v632_v62 = vpop.f32.mrb[4].mxu0 }
 0x4d9   :  { %v633_v63 = vadd.f32 %v1372_v60, %v632_v62  ;;  %v1608_v0 = vpop.f32.mrb[5].mxu0 }
 0x4db   :  { %v636_v3 = vmul.f32 0.2, %v633_v63 }
 0x4dd   :  { %v637_v4 = vmax.f32 %v633_v63, %v636_v3 }
 0x4df   :  { %v638_v5 = vsel %vm321_vm3, %v637_v4, 0.0  ;;  %v641_v6 = vmul.f32 %v637_v4, %v637_v4 }
 0x4e0   :  { %639 = vadd.xlane.f32.xlu0 %v638_v5 }
 0x4e1   :  { %v642_v7 = vsel %vm321_vm3, %v641_v6, 0.0 }
 0x4e2   :  { %643 = vadd.xlane.f32.xlu1 %v642_v7  ;;  %v1396_v7 = vld [vmem:[%s2298_s6 + $0xa0] sm:$0xff] }
 0x4e3   :  { %v1748_v11 = vpack.c.bf16 %v1397_v9, %v1396_v7 }
 0x56d   :  { %v640_v15 = vpop.xlane.xlu0 %639 }
 0x56e   :  { %v645_v16 = vmul.f32 0.03125, %v640_v15 }
 0x56f   :  { %v644_v17 = vpop.xlane.xlu1 %643 }
 0x570   :  { %v647_v18 = vmul.f32 %v645_v16, %v645_v16  ;;  %v646_v19 = vmul.f32 0.03125, %v644_v17  ;;  %v649_v22 = vsub.f32 %v637_v4, %v645_v16 }
 0x572   :  { %v648_v20 = vsub.f32 %v646_v19, %v647_v18 }
 0x574   :  { %v650_v21 = vadd.f32 1e-05, %v648_v20 }
 0x576   :  { %1785 = vrsqrt.f32 %v650_v21 }
 0x580   :  { %v1786_v23 = vpop.eup %1785 }
 0x581   :  { %v652_v25 = vmul.f32 %v1786_v23, %v649_v22 }
 0x583   :  { %v661_v27 = vmul.f32 %v1375_v24, %v652_v25  ;;  %v1401_v24 = vld [vmem:[%s2299_s7 + $0x5] ss:$0 sm:$0xff] }
 0x585   :  { %v670_v28 = vadd.f32 %v1377_v26, %v661_v27 }
 0x587   :  { %1618 = vmatmul.mubr.msk.f32.vlgmr.msra.gmra.mrb[6].mxu1 %vm321_vm3, %v670_v28 }
 0x588   :  { %1639 = vmatprep.mubr.msk.f32.mxu1 %vm1822_vm1, %v1821_v2  ;;  %1749 = vmatpush3.bf16.msra.mxu1 %v1748_v11 }
 0x589   :  { %1750 = vmatprep.subr.bf16.mxu1 %v1823_v8 }
 0x58c   :  { %1752 = vmatpush3.bf16.msra.mxu1 %v1751_v13 }
 0x58d   :  { %1759 = vmatprep.subr.bf16.mxu1 %v1823_v8 }
 0x65a   :  { %v753_v30 = vpop.f32.mrb[6].mxu1 }
 0x65b   :  { %v754_v31 = vadd.f32 %v1383_v29, %v753_v30  ;;  %v1619_v32 = vpop.f32.mrb[7].mxu1 }
 0x65d   :  { %v757_v33 = vmul.f32 0.2, %v754_v31 }
 0x65f   :  { %v758_v34 = vmax.f32 %v754_v31, %v757_v33 }
 0x661   :  { %v759_v35 = vsel %vm321_vm3, %v758_v34, 0.0  ;;  %v762_v36 = vmul.f32 %v758_v34, %v758_v34 }
 0x662   :  { %760 = vadd.xlane.f32.xlu0 %v759_v35 }
 0x663   :  { %v763_v37 = vsel %vm321_vm3, %v762_v36, 0.0 }
 0x664   :  { %764 = vadd.xlane.f32.xlu1 %v763_v37 }
 0x6ef   :  { %v761_v38 = vpop.xlane.xlu0 %760 }
 0x6f0   :  { %v766_v39 = vmul.f32 0.03125, %v761_v38  ;;  %v1407_v38 = vld [vmem:[%s2298_s6 + $0xc0] sm:$0xff] }
 0x6f1   :  { %v765_v40 = vpop.xlane.xlu1 %764 }
 0x6f2   :  { %v768_v41 = vmul.f32 %v766_v39, %v766_v39  ;;  %v767_v42 = vmul.f32 0.03125, %v765_v40  ;;  %v770_v48 = vsub.f32 %v758_v34, %v766_v39  ;;  %v1408_v39 = vld [vmem:[%s2298_s6 + $0xc8] sm:$0xff]  ;;  %v1409_v40 = vld [vmem:[%s2298_s6 + $0xd0] sm:$0xff] }
 0x6f4   :  { %v769_v43 = vsub.f32 %v767_v42, %v768_v41  ;;  %v1754_v41 = vpack.c.bf16 %v1408_v39, %v1407_v38  ;;  %v1410_v42 = vld [vmem:[%s2298_s6 + $0xd8] sm:$0xff]  ;;  %v1424_v39 = vld [vmem:[%s2301_s9 + $0x7] ss:$0 sm:$0xff] }
 0x6f6   :  { %v771_v44 = vadd.f32 1e-05, %v769_v43 }
 0x6f8   :  { %1787 = vrsqrt.f32 %v771_v44  ;;  %v1757_v44 = vpack.c.bf16 %v1410_v42, %v1409_v40 }
 0x702   :  { %v1788_v51 = vpop.eup %1787 }
 0x703   :  { %v773_v53 = vmul.f32 %v1788_v51, %v770_v48  ;;  %v1406_v48 = vld [vmem:[%s2301_s9 + $0x5] ss:$0 sm:$0xff]  ;;  %s1826_s9 = smov [#allocation2]  }
 0x704   :  { %s1339_s23 = sshll.u32 %s1826_s9, 4  ;;  %s1340_s23 = int_to_ptr.vmem [resolvable:$true] %s1339_s23 }
 0x705   :  { %v782_v56 = vmul.f32 %v1386_v52, %v773_v53  ;;  %p1802_p1 = scmp.lt.s32.totalorder %s1340_s23, %s1340_s23 }
 0x707   :  { %v791_v57 = vadd.f32 %v1388_v55, %v782_v56 }
 0x709   :  { %v792_v58 = vadd.f32 %v791_v57, %v2103_v59  ;;  %v1394_v59 = vld [vmem:[%s2299_s7 + $0x4] ss:$0 sm:$0xff] }
 0x70b   :  { %794 = vrot.lane.b32.xlu0 %v792_v58, %s1824_s19 }
 0x77d   :  { %v795_v60 = vpop.permute.xlu0 %794 }
 0x77e   :  { %v2165_v62 = vadd.f32 %v795_v60, %v2043_v61 }
 0x780   :  { %812 = vrot.lane.b32.xlu1 %v2165_v62, %s1825_s20 }
 0x7f2   :  { %v813_v63 = vpop.permute.xlu1 %812 }
 0x7f3   :  { %1629 = vmatmul.mubr.msk.f32.vlgmr.msra.gmra.mrb[6].mxu0 %vm321_vm3, %v813_v63  ;;  %v1414_v63 = vld [vmem:[%s2298_s6 + $0xe0] sm:$0xff] }
 0x7f4   :  { %1650 = vmatprep.mubr.msk.f32.mxu0 %vm1822_vm1, %v1821_v2  ;;  %1755 = vmatpush3.bf16.msra.mxu0 %v1754_v41 }
 0x7f5   :  { %1756 = vmatprep.subr.bf16.mxu0 %v1823_v8 }
 0x7f8   :  { %1758 = vmatpush3.bf16.msra.mxu0 %v1757_v44 }
 0x7f9   :  { %1765 = vmatprep.subr.bf16.mxu0 %v1823_v8 }
 0x8c6   :  { %v882_v0 = vpop.f32.mrb[6].mxu0 }
 0x8c7   :  { %v883_v3 = vadd.f32 %v1394_v59, %v882_v0  ;;  %v1630_v4 = vpop.f32.mrb[7].mxu0  ;;  %v1416_v59 = vld [vmem:[%s2298_s6 + $0xf0] sm:$0xff] }
 0x8c9   :  { %v886_v61 = vsel %vm321_vm3, %v883_v3, 0.0  ;;  %v889_v5 = vmul.f32 %v883_v3, %v883_v3 }
 0x8ca   :  { %887 = vadd.xlane.f32.xlu1 %v886_v61 }
 0x8cb   :  { %v890_v6 = vsel %vm321_vm3, %v889_v5, 0.0 }
 0x8cc   :  { %891 = vadd.xlane.f32.xlu0 %v890_v6 }
 0x957   :  { %v888_v14 = vpop.xlane.xlu1 %887 }
 0x958   :  { %v893_v15 = vmul.f32 0.03125, %v888_v14 }
 0x959   :  { %v892_v16 = vpop.xlane.xlu0 %891 }
 0x95a   :  { %v895_v17 = vmul.f32 %v893_v15, %v893_v15  ;;  %v894_v18 = vmul.f32 0.03125, %v892_v16  ;;  %v897_v21 = vsub.f32 %v883_v3, %v893_v15  ;;  %v1417_v3 = vld [vmem:[%s2298_s6 + $0xf8] sm:$0xff]  ;;  %v1419_v15 = vld [vmem:[%s2299_s7 + $0x7] ss:$0 sm:$0xff] }
 0x95b   :  { %v1763_v4 = vpack.c.bf16 %v1417_v3, %v1416_v59 }
 0x95c   :  { %v896_v19 = vsub.f32 %v894_v18, %v895_v17 }
 0x95e   :  { %v898_v20 = vadd.f32 1e-05, %v896_v19 }
 0x960   :  { %1789 = vrsqrt.f32 %v898_v20 }
 0x96a   :  { %v1790_v22 = vpop.eup %1789 }
 0x96b   :  { %v900_v23 = vmul.f32 %v1790_v22, %v897_v21 }
 0x96d   :  { %1640 = vmatmul.mubr.msk.f32.vlgmr.msra.gmra.mrb[8].mxu1 %vm321_vm3, %v900_v23 }
 0x96e   :  { %1661 = vmatprep.mubr.msk.f32.mxu1 %vm1822_vm1, %v1821_v2 }
 0xa40   :  { %v983_v25 = vpop.f32.mrb[8].mxu1 }
 0xa41   :  { %v984_v26 = vadd.f32 %v1401_v24, %v983_v25  ;;  %v1641_v27 = vpop.f32.mrb[9].mxu1 }
 0xa43   :  { %v987_v28 = vsel %vm321_vm3, %v984_v26, 0.0  ;;  %v990_v29 = vmul.f32 %v984_v26, %v984_v26 }
 0xa44   :  { %988 = vadd.xlane.f32.xlu0 %v987_v28 }
 0xa45   :  { %v991_v30 = vsel %vm321_vm3, %v990_v29, 0.0  ;;  %v1252_v29 = vld [vmem:[%s2302_s10] sm:$0xff] }
 0xa46   :  { %992 = vadd.xlane.f32.xlu1 %v991_v30  ;;  %v1253_v30 = vld [vmem:[%s2302_s10 + $0x8] sm:$0xff] }
 0xad1   :  { %v989_v31 = vpop.xlane.xlu0 %988 }
 0xad2   :  { %v994_v32 = vmul.f32 0.03125, %v989_v31  ;;  %v1254_v31 = vld [vmem:[%s2302_s10 + $0x10] sm:$0xff] }
 0xad3   :  { %v993_v33 = vpop.xlane.xlu1 %992 }
 0xad4   :  { %v996_v34 = vmul.f32 %v994_v32, %v994_v32  ;;  %v995_v35 = vmul.f32 0.03125, %v993_v33  ;;  %v998_v43 = vsub.f32 %v984_v26, %v994_v32  ;;  %v1766_v32 = vpack.c.bf16 %v1253_v30, %v1252_v29  ;;  %v1255_v33 = vld [vmem:[%s2302_s10 + $0x18] sm:$0xff] }
 0xad6   :  { %v997_v36 = vsub.f32 %v995_v35, %v996_v34  ;;  %v1769_v35 = vpack.c.bf16 %v1255_v33, %v1254_v31 }
 0xad8   :  { %v999_v37 = vadd.f32 1e-05, %v997_v36 }
 0xada   :  { %1791 = vrsqrt.f32 %v999_v37  ;;  %v1422_v37 = vld [vmem:[%s2300_s8 + $0x7] ss:$0 sm:$0xff] }
 0xae4   :  { %v1792_v45 = vpop.eup %1791 }
 0xae5   :  { %v1001_v47 = vmul.f32 %v1792_v45, %v998_v43 }
 0xae7   :  { %v1010_v49 = vmul.f32 %v1404_v46, %v1001_v47 }
 0xae9   :  { %v1019_v50 = vadd.f32 %v1406_v48, %v1010_v49 }
 0xaeb   :  { %1021 = vrot.lane.b32.xlu0 %v1019_v50, %s1824_s19 }
 0xb5d   :  { %v1022_v51 = vpop.permute.xlu0 %1021 }
 0xb5e   :  { %v2221_v52 = vadd.f32 %v1022_v51, %v2165_v62 }
 0xb60   :  { %1039 = vrot.lane.b32.xlu1 %v2221_v52, %s1825_s20 }
 0xbd2   :  { %v1040_v53 = vpop.permute.xlu1 %1039 }
 0xbd3   :  { %1651 = vmatmul.mubr.msk.f32.vlgmr.msra.gmra.mrb[8].mxu0 %vm321_vm3, %v1040_v53 }
 0xbd4   :  { %1672 = vmatprep.mubr.msk.f32.mxu0 %vm1822_vm1, %v1821_v2  ;;  %v1415_v2 = vld [vmem:[%s2298_s6 + $0xe8] sm:$0xff]  ;;  %1767 = vmatpush3.bf16.msra.mxu0 %v1766_v32 }
 0xbd5   :  { %v1760_v0 = vpack.c.bf16 %v1415_v2, %v1414_v63  ;;  %1768 = vmatprep.subr.bf16.mxu0 %v1823_v8 }
 0xbd7   :  { %1761 = vmatpush3.bf16.msra.mxu1 %v1760_v0 }
 0xbd8   :  { %1762 = vmatprep.subr.bf16.mxu1 %v1823_v8  ;;  %1770 = vmatpush3.bf16.msra.mxu0 %v1769_v35  ;;  %v1348_v8 = vld [vmem:[%s2303_s11] ss:$0 sm:$0xff] }
 0xbd9   :  { %v1771_v45 = vadd.f32 %v1348_v8, %v1898_v1 }
 0xbdb   :  { %1764 = vmatpush3.bf16.msra.mxu1 %v1763_v4 }
 0xca6   :  { %v1109_v55 = vpop.f32.mrb[8].mxu0 }
 0xca7   :  { %v1110_v56 = vadd.f32 %v1412_v54, %v1109_v55  ;;  %v1652_v57 = vpop.f32.mrb[9].mxu0 }
 0xca9   :  { %v1113_v58 = vsel %vm321_vm3, %v1110_v56, 0.0  ;;  %v1116_v60 = vmul.f32 %v1110_v56, %v1110_v56 }
 0xcaa   :  { %1114 = vadd.xlane.f32.xlu1 %v1113_v58 }
 0xcab   :  { %v1117_v62 = vsel %vm321_vm3, %v1116_v60, 0.0 }
 0xcac   :  { %1118 = vadd.xlane.f32.xlu0 %v1117_v62 }
 0xd37   :  { %v1115_v61 = vpop.xlane.xlu1 %1114 }
 0xd38   :  { %v1120_v5 = vmul.f32 0.03125, %v1115_v61 }
 0xd39   :  { %v1119_v6 = vpop.xlane.xlu0 %1118 }
 0xd3a   :  { %v1122_v7 = vmul.f32 %v1120_v5, %v1120_v5  ;;  %v1121_v9 = vmul.f32 0.03125, %v1119_v6  ;;  %v1124_v12 = vsub.f32 %v1110_v56, %v1120_v5 }
 0xd3c   :  { %v1123_v10 = vsub.f32 %v1121_v9, %v1122_v7 }
 0xd3e   :  { %v1125_v11 = vadd.f32 1e-05, %v1123_v10 }
 0xd40   :  { %1793 = vrsqrt.f32 %v1125_v11 }
 0xd4a   :  { %v1794_v13 = vpop.eup %1793 }
 0xd4b   :  { %v1127_v14 = vmul.f32 %v1794_v13, %v1124_v12 }
 0xd4d   :  { %1662 = vmatmul.mubr.msk.f32.vlgmr.msra.gmra.mrb[10].mxu1 %vm321_vm3, %v1127_v14 }
 0xe20   :  { %v1210_v16 = vpop.f32.mrb[10].mxu1 }
 0xe21   :  { %v1211_v17 = vadd.f32 %v1419_v15, %v1210_v16  ;;  %v1663_v18 = vpop.f32.mrb[11].mxu1 }
 0xe23   :  { %v1214_v19 = vsel %vm321_vm3, %v1211_v17, 0.0  ;;  %v1217_v20 = vmul.f32 %v1211_v17, %v1211_v17 }
 0xe24   :  { %1215 = vadd.xlane.f32.xlu0 %v1214_v19 }
 0xe25   :  { %v1218_v21 = vsel %vm321_vm3, %v1217_v20, 0.0 }
 0xe26   :  { %1219 = vadd.xlane.f32.xlu1 %v1218_v21 }
 0xeb1   :  { %v1216_v22 = vpop.xlane.xlu0 %1215 }
 0xeb2   :  { %v1221_v23 = vmul.f32 0.03125, %v1216_v22 }
 0xeb3   :  { %v1220_v24 = vpop.xlane.xlu1 %1219 }
 0xeb4   :  { %v1223_v25 = vmul.f32 %v1221_v23, %v1221_v23  ;;  %v1222_v26 = vmul.f32 0.03125, %v1220_v24  ;;  %v1225_v34 = vsub.f32 %v1211_v17, %v1221_v23 }
 0xeb6   :  { %v1224_v27 = vsub.f32 %v1222_v26, %v1223_v25 }
 0xeb8   :  { %v1226_v28 = vadd.f32 1e-05, %v1224_v27 }
 0xeba   :  { %1795 = vrsqrt.f32 %v1226_v28 }
 0xec4   :  { %v1796_v36 = vpop.eup %1795 }
 0xec5   :  { %v1228_v38 = vmul.f32 %v1796_v36, %v1225_v34 }
 0xec7   :  { %v1237_v40 = vmul.f32 %v1422_v37, %v1228_v38 }
 0xec9   :  { %v1246_v41 = vadd.f32 %v1424_v39, %v1237_v40 }
 0xecb   :  { %1248 = vrot.lane.b32.xlu0 %v1246_v41, %s1824_s19  ;;  %s1797_s19 = scalar_lea.vmem %s1340_s23, 128 }
 0xecc   :  { %p1798_p0 = scmp.ne.s32.totalorder %s1340_s23, %s1797_s19  ;;  %p1803_p2 = scmp.lt.s32.totalorder %s1797_s19, %s1797_s19 }
 0xece   :  { %p1804_p3 = por %p1803_p2, %p1802_p1 }
 0xed0   :  { %p1805_p4 = pnand %p1804_p3, %p1798_p0 }
 0xf3d   :  { %v1249_v42 = vpop.permute.xlu0 %1248 }
 0xf3e   :  { %v1251_v43 = vadd.f32 %v1249_v42, %v2221_v52 }
 0xf40   :  { %1257 = vrot.lane.b32.xlu1 %v1251_v43, %s1825_s20 }
 0xfb2   :  { %v1258_v44 = vpop.permute.xlu1 %1257 }
 0xfb3   :  { %1673 = vmatmul.mubr.msk.f32.vlgmr.msra.gmra.mrb[0].mxu0 %vm321_vm3, %v1258_v44 }
0x1086   :  { %v1327_v46 = vpop.f32.mrb[0].mxu0 }
0x1087   :  { %v1772_v47 = vadd.f32 %v1771_v45, %v1327_v46  ;;  %v1674_v48 = vpop.f32.mrb[1].mxu0 }
0x1089   :  { %1332 = vst.msk [vmem:[#allocation2] sm:$0xff] %vm158_vm0, %v1772_v47 }
0x108a   :  { %1808 = shalt.err (!%p1805_p4)
}
0x108b   :  { %s1809_s11 = scalar_lea.hbm %s2304_s12, 128 }
0x108c   :  { %p1810_p5 = scmp.ne.s32.totalorder %s2304_s12, %s1809_s11  ;;  %p1813_p6 = scmp.lt.u32.totalorder %s1809_s11, %s2304_s12 }
0x108e   :  { %p1815_p7 = pnand %p1813_p6, %p1810_p5 }
0x1090   :  { %1818 = shalt.err (!%p1815_p7)
}
0x1091   :  { %1342 = dma.vmem_to_hbm [thread:$0]  %s1340_s23, 128, %s2304_s12, [#allocation3]  }
0x1092   :  { %1819 = dma.done.wait [#allocation3], 128  }
0x1093   :  { %1820 = vsyncadd [#allocation3], 4294967168 }
0x1094   :  { %1346 = vsyncpa [#allocation3], 1 }

</bundles_post_ra>
